<compile_context>
chip_gen: v7x
topology: tpu7x:2x2x1
jax: 0.10.0
libtpu: 0.0.40
codegen_flags: <defaults>
</compile_context>

<pallas_src>
import functools

import jax
import jax.numpy as jnp
from jax import lax
from jax.experimental import pallas as pl
from jax.experimental.pallas import tpu as pltpu


def _round_up(v, m):
    return ((v + m - 1) // m) * m


def _cdiv(a, b):
    return -(-a // b)


# ---------------------------------------------------------------------------
# Parameter prep (one-time): transpose PyTorch (n_out, n_in) -> (n_in, n_out)
# and zero-pad feature dims to multiples of 128 (lane-dense, full MXU width).
# Zero padding is exact: padded K rows / N cols contribute nothing.
# ---------------------------------------------------------------------------
def prepare_layer_params(weight, bias):
    n_out, n_in = weight.shape
    n_in_p = _round_up(n_in, 128)
    n_out_p = _round_up(n_out, 128)
    w_t = jnp.zeros((n_in_p, n_out_p), weight.dtype).at[:n_in, :n_out].set(weight.T)
    b_p = jnp.zeros((1, n_out_p), bias.dtype).at[0, :n_out].set(bias)
    return w_t, b_p, n_in, n_out


def prepare_mlp_params(torch_layers):
    """torch_layers: list of (weight (n_out,n_in), bias (n_out,)). Returns a
    flat [w0,b0,w1,b1,...] list of padded params and the true dims."""
    flat, dims = [], []
    for w, b in torch_layers:
        w_p, b_p, n_in, n_out = prepare_layer_params(w, b)
        flat += [w_p, b_p]
        dims.append((n_in, n_out))
    return flat, dims


# ---------------------------------------------------------------------------
# Batch tiling: balanced blocks, sublane-aligned, >=2 (even) grid steps for
# megacore / v7x 2-TC sharding when the batch is large enough.
# ---------------------------------------------------------------------------
def _batch_tiling(B, total_width_p, max_block_b):
    if total_width_p <= 512:           # narrow PINN layers: bigger tiles are free
        max_block_b = max(max_block_b, 1024)
    min_blocks = 2 if B >= 16 else 1   # let both v7x TensorCores work
    n_blocks = max(_cdiv(B, max_block_b), min_blocks)
    if n_blocks > 1 and n_blocks % 2:  # even count balances the two cores
        n_blocks += 1
    TB = _round_up(_cdiv(B, n_blocks), 8)
    B_pad = n_blocks * TB
    return TB, B_pad, n_blocks


def _maybe_pad_input(x, B, B_pad, n_in, n_in_p):
    if (B != B_pad) or (n_in != n_in_p):
        return jnp.zeros((B_pad, n_in_p), x.dtype).at[:B, :n_in].set(x)
    return x  # already aligned: no extra HBM pass


def _resident_spec(shape):
    # Constant index_map -> the block never changes; single-buffer it.
    return pl.BlockSpec(shape, lambda i: (0,) * len(shape),
                        pipeline_mode=pl.Buffered(1))


# ---------------------------------------------------------------------------
# Single layer: Linear [+ tanh]
# ---------------------------------------------------------------------------
def _linear_kernel(x_ref, w_ref, b_ref, o_ref, *, apply_tanh):
    y = lax.dot_general(x_ref[...], w_ref[...],
                        dimension_numbers=(((1,), (0,)), ((), ())),
                        preferred_element_type=jnp.float32) + b_ref[...]
    if apply_tanh:               # static Python flag -> no runtime branch
        y = jnp.tanh(y)          # EUP
    o_ref[...] = y.astype(o_ref.dtype)


def pallas_layer(x, w_padded, b_padded, n_in, n_out, activation=None,
                 max_block_b=512):
    """Forward pass of `layer`: Linear(n_in, n_out) [+ tanh if activation]."""
    B = x.shape[0]
    n_in_p, n_out_p = w_padded.shape
    TB, B_pad, n_blocks = _batch_tiling(B, n_in_p + n_out_p, max_block_b)
    x_p = _maybe_pad_input(x, B, B_pad, n_in, n_in_p)

    itemsize = jnp.dtype(x.dtype).itemsize
    w_bytes = w_padded.size * jnp.dtype(w_padded.dtype).itemsize
    b_bytes = b_padded.size * jnp.dtype(b_padded.dtype).itemsize
    vmem_needed = ((2 * TB * (n_in_p + n_out_p)) * itemsize  # dbl-buffered x/out
                   + w_bytes + b_bytes + (2 << 20))          # residents + headroom
    vmem_limit = int(min(max(vmem_needed, 16 << 20), 64 << 20))

    cost = pl.CostEstimate(
        flops=2 * B_pad * n_in_p * n_out_p,
        transcendentals=B_pad * n_out_p if activation else 0,
        bytes_accessed=B_pad * (n_in_p + n_out_p) * itemsize + w_bytes + b_bytes)

    kernel = functools.partial(_linear_kernel, apply_tanh=bool(activation))

    out = pl.pallas_call(
        kernel,
        out_shape=jax.ShapeDtypeStruct((B_pad, n_out_p), x.dtype),
        grid=(n_blocks,),
        in_specs=[
            pl.BlockSpec((TB, n_in_p), lambda i: (i, 0)),   # batch-tiled x
            _resident_spec((n_in_p, n_out_p)),              # resident W (1-buf)
            _resident_spec((1, n_out_p)),                   # resident bias
        ],
        out_specs=pl.BlockSpec((TB, n_out_p), lambda i: (i, 0)),
        compiler_params=pltpu.CompilerParams(
            dimension_semantics=("parallel",),
            vmem_limit_bytes=vmem_limit),
        cost_estimate=cost,
    )(x_p, w_padded, b_padded)

    if B == B_pad and n_out == n_out_p:
        return out                       # no extra HBM copy when aligned
    return out[:B, :n_out]


# ---------------------------------------------------------------------------
# Fused PINN MLP: all layers in one pallas_call, activations never touch HBM.
# ---------------------------------------------------------------------------
def _mlp_kernel(x_ref, *refs, n_layers, tanh_mask):
    o_ref = refs[-1]
    wb = refs[:-1]                       # (w0, b0, w1, b1, ...)
    h = x_ref[...]
    for l in range(n_layers):            # static unrolled layer loop
        w = wb[2 * l][...]
        b = wb[2 * l + 1][...]
        h = lax.dot_general(h, w,
                            dimension_numbers=(((1,), (0,)), ((), ())),
                            preferred_element_type=jnp.float32) + b
        if tanh_mask[l]:
            h = jnp.tanh(h)
    o_ref[...] = h.astype(o_ref.dtype)


def pallas_mlp(x, flat_params, dims, hidden_activation=True,
               last_activation=False, max_block_b=1024):
    """Fused stack of `layer` modules (Linear + tanh on hidden layers)."""
    B = x.shape[0]
    n_layers = len(dims)
    n_in, _ = dims[0]
    _, n_out_last = dims[-1]
    n_in_p = flat_params[0].shape[0]
    n_out_p = flat_params[-2].shape[1]

    TB, B_pad, n_blocks = _batch_tiling(B, n_in_p + n_out_p, max_block_b)
    x_p = _maybe_pad_input(x, B, B_pad, n_in, n_in_p)

    tanh_mask = tuple(bool(hidden_activation) if l < n_layers - 1
                      else bool(last_activation) for l in range(n_layers))

    itemsize = jnp.dtype(x.dtype).itemsize
    param_bytes = sum(p.size * jnp.dtype(p.dtype).itemsize for p in flat_params)
    flops = 0
    transcendentals = 0
    max_width_p = n_in_p
    for l, wp in enumerate(flat_params[0::2]):
        k_p, m_p = wp.shape
        flops += 2 * B_pad * k_p * m_p
        max_width_p = max(max_width_p, m_p)
        if tanh_mask[l]:
            transcendentals += B_pad * m_p
    vmem_needed = ((2 * TB * (n_in_p + n_out_p)) * itemsize    # dbl-buffered x/out
                   + 2 * TB * max_width_p * 4                  # live f32 activation
                   + param_bytes + (2 << 20))
    vmem_limit = int(min(max(vmem_needed, 16 << 20), 64 << 20))

    cost = pl.CostEstimate(
        flops=flops, transcendentals=transcendentals,
        bytes_accessed=B_pad * (n_in_p + n_out_p) * itemsize + param_bytes)

    kernel = functools.partial(_mlp_kernel, n_layers=n_layers, tanh_mask=tanh_mask)

    param_specs = []
    for p in flat_params:
        param_specs.append(_resident_spec(p.shape))          # all W/b resident

    out = pl.pallas_call(
        kernel,
        out_shape=jax.ShapeDtypeStruct((B_pad, n_out_p), x.dtype),
        grid=(n_blocks,),
        in_specs=[pl.BlockSpec((TB, n_in_p), lambda i: (i, 0))] + param_specs,
        out_specs=pl.BlockSpec((TB, n_out_p), lambda i: (i, 0)),
        compiler_params=pltpu.CompilerParams(
            dimension_semantics=("parallel",),
            vmem_limit_bytes=vmem_limit),
        cost_estimate=cost,
    )(x_p, *flat_params)

    if B == B_pad and n_out_last == n_out_p:
        return out
    return out[:B, :n_out_last]


# ---------------------------------------------------------------------------
# Deterministic init mimicking nn.Linear's uniform(-1/sqrt(n_in), 1/sqrt(n_in))
# ---------------------------------------------------------------------------
def init_linear_params(key, n_in, n_out, dtype=jnp.float32):
    kw, kb = jax.random.split(key)
    bound = 1.0 / (n_in ** 0.5)
    weight = jax.random.uniform(kw, (n_out, n_in), dtype=dtype,
                                minval=-bound, maxval=bound)
    bias = jax.random.uniform(kb, (n_out,), dtype=dtype,
                              minval=-bound, maxval=bound)
    return weight, bias


# TODO(synk): the PyTorch module accepts arbitrary activation callables; the
# kernel implements the standard PINN choice (tanh) or identity.  bf16 x/W
# with f32 accumulation is an easy further 2x HBM/MXU win on v6e/v7x if the
# training loop tolerates it.

if __name__ == "__main__":
    key = jax.random.PRNGKey(0)
    k_x, k_p, k_mlp = jax.random.split(key, 3)

    # --- single `layer` module: Linear(32, 32) + tanh, batch 8 -------------
    B, n_in, n_out = 8, 32, 32
    x = jax.random.normal(k_x, (B, n_in), dtype=jnp.float32)
    weight, bias = init_linear_params(k_p, n_in, n_out)
    w_p, b_p, n_in_, n_out_ = prepare_layer_params(weight, bias)

    out = pallas_layer(x, w_p, b_p, n_in_, n_out_, activation=True)
    jax.block_until_ready(out)
    ref = jnp.tanh(x @ weight.T + bias[None, :])
    assert out.shape == (B, n_out)
    assert jnp.allclose(out, ref, atol=1e-5, rtol=1e-5)

    # activation=None path of the module
    out_lin = pallas_layer(x, w_p, b_p, n_in_, n_out_, activation=None)
    jax.block_until_ready(out_lin)
    ref_lin = x @ weight.T + bias[None, :]
    assert jnp.allclose(out_lin, ref_lin, atol=1e-5, rtol=1e-5)

    # --- fused PINN MLP: 2 -> 32 -> 32 -> 2, tanh on hidden layers ----------
    chain = [2, 32, 32, 2]
    keys = jax.random.split(k_mlp, len(chain) - 1)
    torch_layers = [init_linear_params(keys[i], chain[i], chain[i + 1])
                    for i in range(len(chain) - 1)]
    flat, dims = prepare_mlp_params(torch_layers)

    B_mlp = 64
    x_mlp = jax.random.normal(k_x, (B_mlp, chain[0]), dtype=jnp.float32)
    out_mlp = pallas_mlp(x_mlp, flat, dims,
                         hidden_activation=True, last_activation=False)
    jax.block_until_ready(out_mlp)

    h = x_mlp
    for i, (w, b) in enumerate(torch_layers):
        h = h @ w.T + b[None, :]
        if i < len(torch_layers) - 1:
            h = jnp.tanh(h)
    assert out_mlp.shape == (B_mlp, chain[-1])
    assert jnp.allclose(out_mlp, h, atol=1e-4, rtol=1e-4)

    print("KERNEL_OK")
</pallas_src>

<mosaic_0001>
module attributes {stable_mosaic.version = 11 : i64} {
  func.func @_linear_kernel(%arg0: i32, %arg1: memref<8x128xf32, #tpu.memory_space<vmem>>, %arg2: memref<128x128xf32, #tpu.memory_space<vmem>>, %arg3: memref<1x128xf32, #tpu.memory_space<vmem>>, %arg4: memref<8x128xf32, #tpu.memory_space<vmem>>) attributes {dimension_semantics = [#tpu.dimension_semantics<parallel>], iteration_bounds = array<i64: 1>, scalar_prefetch = 0 : i64, scratch_operands = 0 : i64, tpu.core_type = #tpu.core_type<tc>, window_params = [{transform_indices = @transform_0, window_bounds = array<i64: 8, 128>}, {pipeline_mode = #tpu.pipeline_mode<synchronous>, transform_indices = @transform_1, window_bounds = array<i64: 128, 128>}, {pipeline_mode = #tpu.pipeline_mode<synchronous>, transform_indices = @transform_2, window_bounds = array<i64: 1, 128>}, {transform_indices = @transform_3, window_bounds = array<i64: 8, 128>}]} {
    %c0 = arith.constant 0 : index
    %c0_0 = arith.constant 0 : index
    %0 = vector.load %arg1[%c0, %c0_0] : memref<8x128xf32, #tpu.memory_space<vmem>>, vector<8x128xf32>
    %c0_1 = arith.constant 0 : index
    %c0_2 = arith.constant 0 : index
    %1 = vector.load %arg2[%c0_1, %c0_2] : memref<128x128xf32, #tpu.memory_space<vmem>>, vector<128x128xf32>
    %cst = arith.constant dense<0.000000e+00> : vector<8x128xf32>
    %2 = tpu.matmul %0, %1, %cst {dimension_numbers = #tpu.dot_dimension_numbers<[1], [0], [0], [1], [0, 0, 1, 1], [], []>} : vector<8x128xf32>, vector<128x128xf32>, vector<8x128xf32> -> vector<8x128xf32>
    %c0_3 = arith.constant 0 : index
    %c0_4 = arith.constant 0 : index
    %3 = vector.load %arg3[%c0_3, %c0_4] : memref<1x128xf32, #tpu.memory_space<vmem>>, vector<1x128xf32>
    %4 = vector.broadcast %3 : vector<1x128xf32> to vector<8x128xf32>
    %5 = arith.addf %2, %4 : vector<8x128xf32>
    %6 = math.tanh %5 : vector<8x128xf32>
    %c0_5 = arith.constant 0 : index
    %c0_6 = arith.constant 0 : index
    %7 = vector.load %arg4[%c0_5, %c0_6] : memref<8x128xf32, #tpu.memory_space<vmem>>, vector<8x128xf32>
    tpu.vector_store %arg4[%c0_5, %c0_6], %6 {strides = array<i32>} : memref<8x128xf32, #tpu.memory_space<vmem>>, vector<8x128xf32>,
    return
  }
  func.func @transform_0(%arg0: i32) -> (i32, i32) {
    %c0_i32 = arith.constant 0 : i32
    %c0_i32_0 = arith.constant 0 : i32
    return %arg0, %c0_i32 : i32, i32
  }
  func.func @transform_1(%arg0: i32) -> (i32, i32) {
    %c0_i32 = arith.constant 0 : i32
    %c0_i32_0 = arith.constant 0 : i32
    %c0_i32_1 = arith.constant 0 : i32
    return %c0_i32, %c0_i32_0 : i32, i32
  }
  func.func @transform_2(%arg0: i32) -> (i32, i32) {
    %c0_i32 = arith.constant 0 : i32
    %c0_i32_0 = arith.constant 0 : i32
    %c0_i32_1 = arith.constant 0 : i32
    return %c0_i32, %c0_i32_0 : i32, i32
  }
  func.func @transform_3(%arg0: i32) -> (i32, i32) {
    %c0_i32 = arith.constant 0 : i32
    %c0_i32_0 = arith.constant 0 : i32
    return %arg0, %c0_i32 : i32, i32
  }
}

</mosaic_0001>

<bundles_post_ra>
// kernel: tpu_custom_call.1
= control target key start
LH: loop header
LB: loop body
LE: loop exit
PB: predicated region body
PF: predicated region fallthrough
CT: control target
= control target key end

     0   :  { %8 = vsyncpa [#allocation3], 0  ;;  %s386_s0 = inlined_call_operand.hbm [shape: f32[8,128], index: 0, kind: input, shape index: {}]   ;;  %s387_s1 = inlined_call_operand.hbm [shape: f32[128,128], index: 1, kind: input, shape index: {}]   ;;  %s388_s2 = inlined_call_operand.vmem [shape: f32[1,128], index: 2, kind: input, shape index: {}]   ;;  %s389_s3 = inlined_call_operand.hbm [shape: f32[8,128], index: 3, kind: output, shape index: {}]  }
   0x1   :  { %9 = vsyncpa [#allocation6], 0 }
   0x2   :  { %10 = vsyncpa [#allocation4], 0  ;;  %s312_s12 = smov [#allocation2]   ;;  %s313_s14 = smov [#allocation5]  }
   0x3   :  { %s17_s13 = sshll.u32 %s312_s12, 4  ;;  %s26_s15 = sshll.u32 %s313_s14, 4  ;;  %s18_s13 = int_to_ptr.vmem [resolvable:$true] %s17_s13  ;;  %s340_s15 = int_to_ptr.vmem [resolvable:$true] %s26_s15 }
   0x4   :  { %s240_s18 = scalar_lea.hbm %s386_s0, 128 }
   0x5   :  { %p241_p0 = scmp.ne.s32.totalorder %s386_s0, %s240_s18  ;;  %p244_p1 = scmp.lt.u32.totalorder %s240_s18, %s386_s0 }
   0x7   :  { %p246_p2 = pnand %p244_p1, %p241_p0 }
   0x9   :  { %249 = shalt.err (!%p246_p2)
}
   0xa   :  { %s250_s23 = scalar_lea.vmem %s18_s13, 128  ;;  %p255_p4 = scmp.lt.s32.totalorder %s18_s13, %s18_s13 }
   0xb   :  { %p251_p3 = scmp.ne.s32.totalorder %s18_s13, %s250_s23  ;;  %p256_p5 = scmp.lt.s32.totalorder %s250_s23, %s250_s23 }
   0xd   :  { %p257_p6 = por %p256_p5, %p255_p4 }
   0xf   :  { %p258_p7 = pnand %p257_p6, %p251_p3 }
  0x11   :  { %261 = shalt.err (!%p258_p7)
}
  0x12   :  { %20 = dma.hbm_to_vmem [thread:$0]  %s386_s0, 128, %s18_s13, [#allocation3]  }
  0x13   :  { %s262_s28 = scalar_lea.hbm %s387_s1, 2048 }
  0x14   :  { %p263_p8 = scmp.ne.s32.totalorder %s387_s1, %s262_s28  ;;  %p266_p9 = scmp.lt.u32.totalorder %s262_s28, %s387_s1 }
  0x16   :  { %p268_p10 = pnand %p266_p9, %p263_p8 }
  0x18   :  { %271 = shalt.err (!%p268_p10)
}
  0x19   :  { %s272_s6 = scalar_lea.vmem %s340_s15, 2048  ;;  %p277_p12 = scmp.lt.s32.totalorder %s340_s15, %s340_s15 }
  0x1a   :  { %p273_p11 = scmp.ne.s32.totalorder %s340_s15, %s272_s6  ;;  %p278_p13 = scmp.lt.s32.totalorder %s272_s6, %s272_s6 }
  0x1c   :  { %p279_p0 = por %p278_p13, %p277_p12 }
  0x1e   :  { %p280_p1 = pnand %p279_p0, %p273_p11 }
  0x20   :  { %283 = shalt.err (!%p280_p1)
}
  0x21   :  { %s314_s0 = smov 128   ;;  %s315_s7 = smov 8  }
  0x22   :  { %32 = dma.hbm_to_vmem [thread:$0]  %s387_s1, 2048, %s340_s15, [#allocation6], %s314_s0, %s314_s0, %s315_s7  }
  0x23   :  { %306 = dma.done.wait [#allocation3], 128  }
  0x24   :  { %307 = vsyncadd [#allocation3], 4294967168 }
  0x25   :  { %308 = dma.done.wait [#allocation6], 2048  }
  0x26   :  { %309 = vsyncadd [#allocation6], 4294965248  ;;  %v316_v0 = vmov 0.0|0.0   ;;  %vm317_vm0 = vmmov 0   ;;  %v318_v1 = vmov 0.0   ;;  %v42_v2 = vld [vmem:[#allocation5] sm:$0xff] }
  0x27   :  { %206 = vmatprep.subr.bf16.mxu0 %v316_v0  ;;  %203 = vmatprep.mubr.msk.f32.mxu0 %vm317_vm0, %v318_v1  ;;  %v43_v3 = vld [vmem:[#allocation5 + $0x8] sm:$0xff]  ;;  %v44_v4 = vld [vmem:[#allocation5 + $0x10] sm:$0xff]  ;;  %v45_v6 = vld [vmem:[#allocation5 + $0x18] sm:$0xff]  ;;  %s319_s11 = smov [#allocation7]  }
  0x28   :  { %v207_v5 = vpack.c.bf16 %v43_v3, %v42_v2  ;;  %v210_v7 = vpack.c.bf16 %v45_v6, %v44_v4  ;;  %v46_v8 = vld [vmem:[#allocation5 + $0x20] sm:$0xff]  ;;  %v47_v9 = vld [vmem:[#allocation5 + $0x28] sm:$0xff]  ;;  %v48_v11 = vld [vmem:[#allocation5 + $0x30] sm:$0xff]  ;;  %s143_s12 = sshll.u32 %s319_s11, 4  ;;  %s144_s12 = int_to_ptr.vmem [resolvable:$true] %s143_s12 }
  0x29   :  { %v213_v10 = vpack.c.bf16 %v47_v9, %v46_v8  ;;  %v49_v12 = vld [vmem:[#allocation5 + $0x38] sm:$0xff]  ;;  %v50_v14 = vld [vmem:[#allocation5 + $0x40] sm:$0xff]  ;;  %v51_v15 = vld [vmem:[#allocation5 + $0x48] sm:$0xff]  ;;  %s284_s13 = scalar_lea.vmem %s144_s12, 128  ;;  %p289_p3 = scmp.lt.s32.totalorder %s144_s12, %s144_s12 }
  0x2a   :  { %208 = vmatpush3.bf16.msra.mxu0 %v207_v5  ;;  %v216_v13 = vpack.c.bf16 %v49_v12, %v48_v11  ;;  %v219_v16 = vpack.c.bf16 %v51_v15, %v50_v14  ;;  %v52_v17 = vld [vmem:[#allocation5 + $0x50] sm:$0xff]  ;;  %v53_v18 = vld [vmem:[#allocation5 + $0x58] sm:$0xff]  ;;  %v54_v20 = vld [vmem:[#allocation5 + $0x60] sm:$0xff]  ;;  %p285_p2 = scmp.ne.s32.totalorder %s144_s12, %s284_s13  ;;  %p290_p4 = scmp.lt.s32.totalorder %s284_s13, %s284_s13 }
  0x2b   :  { %209 = vmatprep.subr.bf16.mxu0 %v316_v0  ;;  %v222_v19 = vpack.c.bf16 %v53_v18, %v52_v17  ;;  %v55_v21 = vld [vmem:[#allocation5 + $0x68] sm:$0xff]  ;;  %v56_v23 = vld [vmem:[#allocation5 + $0x70] sm:$0xff]  ;;  %v57_v24 = vld [vmem:[#allocation5 + $0x78] sm:$0xff] }
  0x2c   :  { %v225_v22 = vpack.c.bf16 %v55_v21, %v54_v20  ;;  %v228_v25 = vpack.c.bf16 %v57_v24, %v56_v23  ;;  %v41_v26 = vld [vmem:[#allocation2] sm:$0xff]  ;;  %p291_p5 = por %p290_p4, %p289_p3 }
  0x2d   :  { %v153_v27 = vld [vmem:[%s388_s2] ss:$0 sm:$0xff] }
  0x2e   :  { %211 = vmatpush3.bf16.msra.mxu0 %v210_v7  ;;  %p292_p6 = pnand %p291_p5, %p285_p2 }
  0x2f   :  { %212 = vmatprep.subr.bf16.mxu0 %v316_v0 }
  0x32   :  { %214 = vmatpush3.bf16.msra.mxu0 %v213_v10 }
  0x33   :  { %215 = vmatprep.subr.bf16.mxu0 %v316_v0 }
  0x36   :  { %217 = vmatpush3.bf16.msra.mxu0 %v216_v13 }
  0x37   :  { %218 = vmatprep.subr.bf16.mxu0 %v316_v0 }
  0x3a   :  { %220 = vmatpush3.bf16.msra.mxu0 %v219_v16 }
  0x3b   :  { %221 = vmatprep.subr.bf16.mxu0 %v316_v0 }
  0x3e   :  { %223 = vmatpush3.bf16.msra.mxu0 %v222_v19 }
  0x3f   :  { %224 = vmatprep.subr.bf16.mxu0 %v316_v0 }
  0x42   :  { %226 = vmatpush3.bf16.msra.mxu0 %v225_v22 }
  0x43   :  { %227 = vmatprep.subr.bf16.mxu0 %v316_v0 }
  0x46   :  { %229 = vmatpush3.bf16.msra.mxu0 %v228_v25 }
  0x49   :  { %204 = vmatmul.mubr.f32.vlgmr.msra.gmra.mrb[0].mxu0 %v41_v26 }
 0x11c   :  { %v131_v28 = vpop.f32.mrb[0].mxu0 }
 0x11d   :  { %v132_v29 = vadd.f32 %v153_v27, %v131_v28  ;;  %v205_v30 = vpop.f32.mrb[1].mxu0 }
 0x11f   :  { %238 = vtanh.f32 %v132_v29 }
 0x129   :  { %v239_v31 = vpop.eup %238 }
 0x12a   :  { %136 = vst [vmem:[#allocation7] sm:$0xff] %v239_v31 }
 0x12b   :  { %295 = shalt.err (!%p292_p6)
}
 0x12c   :  { %s296_s2 = scalar_lea.hbm %s389_s3, 128 }
 0x12d   :  { %p297_p7 = scmp.ne.s32.totalorder %s389_s3, %s296_s2  ;;  %p300_p8 = scmp.lt.u32.totalorder %s296_s2, %s389_s3 }
 0x12f   :  { %p302_p9 = pnand %p300_p8, %p297_p7 }
 0x131   :  { %305 = shalt.err (!%p302_p9)
}
 0x132   :  { %146 = dma.vmem_to_hbm [thread:$0]  %s144_s12, 128, %s389_s3, [#allocation4]  }
 0x133   :  { %310 = dma.done.wait [#allocation4], 128  }
 0x134   :  { %311 = vsyncadd [#allocation4], 4294967168 }
 0x135   :  { %150 = vsyncpa [#allocation3], 1 }
 0x136   :  { %151 = vsyncpa [#allocation6], 1 }
 0x137   :  { %152 = vsyncpa [#allocation4], 1 }

</bundles_post_ra>
